<compile_context>
chip_gen: v7x
topology: tpu7x:2x2x1
jax: 0.10.0
libtpu: 0.0.40
codegen_flags: <defaults>
</compile_context>

<pallas_src>
import jax
import jax.numpy as jnp
from jax import lax
from jax.experimental import pallas as pl
from jax.experimental.pallas import tpu as pltpu


def _combiner_kernel(w_ref, x_ref, wbig_ref, proj_ref, b_ref, o_ref):
    # w_ref    : (1, N)   raw (pre-softmax) mixing weights, f32
    # x_ref    : (tb, K)  inputs, K = D*N, xk[b, d*N + n] = x_orig[b, d, n]
    # wbig_ref : (K, D)   row-replicated transposed Linear weight: wbig[d*N+n, e] = W[e, d]
    # proj_ref : (K, N)   constant 0/1 mask: proj[k, n] = (k % N == n), f32
    # b_ref    : (1, D)   Linear bias, f32
    # o_ref    : (tb, D)

    # Softmax over the n_vec mixing weights (tiny; EUP reciprocal is free slack).
    w = w_ref[...]
    w = w - jnp.max(w, axis=-1, keepdims=True)
    e = jnp.exp(w)
    sw = e * pl.reciprocal(jnp.sum(e, axis=-1, keepdims=True), approx=True)   # (1, N)

    # scol[k, 0] = sw[0, k % N] via a tiny MXU matmul against the resident mask
    # (avoids any sublane<->lane reshape of the softmax row).
    scol = lax.dot_general(
        proj_ref[...], sw,
        dimension_numbers=(((1,), (1,)), ((), ())),
        preferred_element_type=jnp.float32)                                   # (K, 1)

    # Fold the softmax scale into the SMALL weight (K*D elements), never into x.
    w_scaled = (wbig_ref[...] * scol).astype(x_ref.dtype)                     # (K, D)

    # Fused weighted-combine + Linear: one (tb, K) @ (K, D) MXU matmul, f32 acc.
    y = lax.dot_general(
        x_ref[...], w_scaled,
        dimension_numbers=(((1,), (0,)), ((), ())),
        preferred_element_type=jnp.float32)                                   # (tb, D)
    o_ref[...] = (y + b_ref[...]).astype(o_ref.dtype)


def _pick_tb(batch, sublane):
    # Whole batch in one block when small (full-extent block is always legal);
    # otherwise large tiles for HBM efficiency while keeping >= 2 grid steps so
    # the "parallel" batch axis can shard across v7x's two TensorCores.
    if batch <= 1024:
        return batch
    tb = min(4096, -(-batch // 2))                 # cdiv(batch, 2), capped
    tb = max(sublane, (tb // sublane) * sublane)   # sublane-aligned tile rows
    return tb


def weighted_combiner(x, weights, lin_w, lin_b, *, cast_to_bf16=False):
    """x: (B, final_dims, n_vec); weights: (n_vec,); lin_w: (D, D); lin_b: (D,)."""
    B, D, N = x.shape
    K = D * N
    out_dtype = x.dtype

    if cast_to_bf16:
        # Mem-bound kernel: bf16 halves x traffic; accumulation stays f32 and the
        # softmax scale is applied to the f32-derived weight, never to bf16 x.
        x = x.astype(jnp.bfloat16)

    # Free reshape: k = d*N + n matches row-major (B, D, N) layout. No transpose.
    xk = x.reshape(B, K)

    # Layout prep only (weight replication, constant mask) — all math is in-kernel.
    w_big = jnp.repeat(jnp.transpose(lin_w), N, axis=0).astype(xk.dtype)      # (K, D)
    proj = (jnp.arange(K, dtype=jnp.int32)[:, None] % N
            == jnp.arange(N, dtype=jnp.int32)[None, :]).astype(jnp.float32)   # (K, N)

    sublane = 16 if xk.dtype == jnp.bfloat16 else 8
    tb = _pick_tb(B, sublane)
    grid = (pl.cdiv(B, tb),)

    return pl.pallas_call(
        _combiner_kernel,
        out_shape=jax.ShapeDtypeStruct((B, D), out_dtype),
        grid=grid,
        in_specs=[
            pl.BlockSpec((1, N), lambda i: (0, 0)),     # mixing weights (resident)
            pl.BlockSpec((tb, K), lambda i: (i, 0)),    # x tiles over batch
            pl.BlockSpec((K, D), lambda i: (0, 0)),     # replicated Linear weight
            pl.BlockSpec((K, N), lambda i: (0, 0)),     # constant 0/1 mask
            pl.BlockSpec((1, D), lambda i: (0, 0)),     # bias
        ],
        out_specs=pl.BlockSpec((tb, D), lambda i: (i, 0)),
        compiler_params=pltpu.CompilerParams(
            dimension_semantics=("parallel",),
            vmem_limit_bytes=32 * 1024 * 1024,          # within v7x's 64 MiB physical
        ),
    )(weights.astype(jnp.float32).reshape(1, N), xk, w_big, proj,
      lin_b.astype(jnp.float32).reshape(1, D))


def _reference(x, weights, lin_w, lin_b):
    sw = jax.nn.softmax(weights)               # softmax over the (n_vec,) vector
    combined = jnp.sum(x * sw, axis=2)         # (B, D)
    return combined @ lin_w.T + lin_b


if __name__ == "__main__":
    # Small shapes implied by the module: opt.n_vec models, opt.final_dims features.
    B, final_dims, n_vec = 2, 32, 8

    key = jax.random.PRNGKey(0)
    kx, kw, klw, klb = jax.random.split(key, 4)

    x = jax.random.normal(kx, (B, final_dims, n_vec), dtype=jnp.float32)
    weights = jax.random.normal(kw, (n_vec,), dtype=jnp.float32)          # nn.Parameter(randn(n_vec))
    # Deterministic stand-in for nn.Linear(final_dims, final_dims) params.
    bound = 1.0 / (final_dims ** 0.5)
    lin_w = jax.random.uniform(klw, (final_dims, final_dims),
                               minval=-bound, maxval=bound, dtype=jnp.float32)
    lin_b = jax.random.uniform(klb, (final_dims,),
                               minval=-bound, maxval=bound, dtype=jnp.float32)

    out = weighted_combiner(x, weights, lin_w, lin_b)
    out = jax.block_until_ready(out)

    ref = _reference(x, weights, lin_w, lin_b)
    assert out.shape == (B, final_dims)
    # Tolerance covers the EUP approximate reciprocal in the softmax denominator
    # (~1e-4 relative); any real layout/indexing bug would produce O(1) errors.
    assert jnp.allclose(out, ref, atol=2e-3, rtol=2e-3)

    print("KERNEL_OK")
</pallas_src>

<mosaic_0001>
module attributes {stable_mosaic.version = 11 : i64} {
  func.func @_combiner_kernel(%arg0: i32, %arg1: memref<1x8xf32, #tpu.memory_space<vmem>>, %arg2: memref<2x256xf32, #tpu.memory_space<vmem>>, %arg3: memref<256x32xf32, #tpu.memory_space<vmem>>, %arg4: memref<256x8xf32, #tpu.memory_space<vmem>>, %arg5: memref<1x32xf32, #tpu.memory_space<vmem>>, %arg6: memref<2x32xf32, #tpu.memory_space<vmem>>) attributes {dimension_semantics = [#tpu.dimension_semantics<parallel>], iteration_bounds = array<i64: 1>, scalar_prefetch = 0 : i64, scratch_operands = 0 : i64, tpu.core_type = #tpu.core_type<tc>, window_params = [{pipeline_mode = #tpu.pipeline_mode<synchronous>, transform_indices = @transform_0, window_bounds = array<i64: 1, 8>}, {transform_indices = @transform_1, window_bounds = array<i64: 2, 256>}, {pipeline_mode = #tpu.pipeline_mode<synchronous>, transform_indices = @transform_2, window_bounds = array<i64: 256, 32>}, {pipeline_mode = #tpu.pipeline_mode<synchronous>, transform_indices = @transform_3, window_bounds = array<i64: 256, 8>}, {pipeline_mode = #tpu.pipeline_mode<synchronous>, transform_indices = @transform_4, window_bounds = array<i64: 1, 32>}, {transform_indices = @transform_5, window_bounds = array<i64: 2, 32>}]} {
    %c0 = arith.constant 0 : index
    %c0_0 = arith.constant 0 : index
    %0 = vector.load %arg1[%c0, %c0_0] : memref<1x8xf32, #tpu.memory_space<vmem>>, vector<1x8xf32>
    %cst = arith.constant dense<0xFF800000> : vector<1xf32>
    %1 = vector.multi_reduction <maximumf>, %0, %cst [1] : vector<1x8xf32> to vector<1xf32>
    %2 = vector.shape_cast %1 : vector<1xf32> to vector<1x1xf32>
    %3 = vector.broadcast %2 : vector<1x1xf32> to vector<1x8xf32>
    %4 = arith.subf %0, %3 : vector<1x8xf32>
    %5 = math.exp %4 : vector<1x8xf32>
    %cst_1 = arith.constant dense<0.000000e+00> : vector<1xf32>
    %6 = vector.multi_reduction <add>, %5, %cst_1 [1] : vector<1x8xf32> to vector<1xf32>
    %7 = vector.shape_cast %6 : vector<1xf32> to vector<1x1xf32>
    %8 = tpu.reciprocal %7 {approx = true} : vector<1x1xf32> -> vector<1x1xf32>
    %9 = vector.broadcast %8 : vector<1x1xf32> to vector<1x8xf32>
    %10 = arith.mulf %5, %9 : vector<1x8xf32>
    %c0_2 = arith.constant 0 : index
    %c0_3 = arith.constant 0 : index
    %11 = vector.load %arg4[%c0_2, %c0_3] : memref<256x8xf32, #tpu.memory_space<vmem>>, vector<256x8xf32>
    %cst_4 = arith.constant dense<0.000000e+00> : vector<256x1xf32>
    %12 = tpu.matmul %11, %10, %cst_4 {dimension_numbers = #tpu.dot_dimension_numbers<[1], [1], [0], [0], [0, 0, 1, 0], [], []>} : vector<256x8xf32>, vector<1x8xf32>, vector<256x1xf32> -> vector<256x1xf32>
    %c0_5 = arith.constant 0 : index
    %c0_6 = arith.constant 0 : index
    %13 = vector.load %arg3[%c0_5, %c0_6] : memref<256x32xf32, #tpu.memory_space<vmem>>, vector<256x32xf32>
    %14 = vector.broadcast %12 : vector<256x1xf32> to vector<256x32xf32>
    %15 = arith.mulf %13, %14 : vector<256x32xf32>
    %c0_7 = arith.constant 0 : index
    %c0_8 = arith.constant 0 : index
    %16 = vector.load %arg2[%c0_7, %c0_8] : memref<2x256xf32, #tpu.memory_space<vmem>>, vector<2x256xf32>
    %cst_9 = arith.constant dense<0.000000e+00> : vector<2x32xf32>
    %17 = tpu.matmul %16, %15, %cst_9 {dimension_numbers = #tpu.dot_dimension_numbers<[1], [0], [0], [1], [0, 0, 1, 1], [], []>} : vector<2x256xf32>, vector<256x32xf32>, vector<2x32xf32> -> vector<2x32xf32>
    %c0_10 = arith.constant 0 : index
    %c0_11 = arith.constant 0 : index
    %18 = vector.load %arg5[%c0_10, %c0_11] : memref<1x32xf32, #tpu.memory_space<vmem>>, vector<1x32xf32>
    %19 = vector.broadcast %18 : vector<1x32xf32> to vector<2x32xf32>
    %20 = arith.addf %17, %19 : vector<2x32xf32>
    %c0_12 = arith.constant 0 : index
    %c0_13 = arith.constant 0 : index
    %21 = vector.load %arg6[%c0_12, %c0_13] : memref<2x32xf32, #tpu.memory_space<vmem>>, vector<2x32xf32>
    tpu.vector_store %arg6[%c0_12, %c0_13], %20 {strides = array<i32>} : memref<2x32xf32, #tpu.memory_space<vmem>>, vector<2x32xf32>,
    return
  }
  func.func @transform_0(%arg0: i32) -> (i32, i32) {
    %c0_i32 = arith.constant 0 : i32
    %c0_i32_0 = arith.constant 0 : i32
    %c0_i32_1 = arith.constant 0 : i32
    return %c0_i32, %c0_i32_0 : i32, i32
  }
  func.func @transform_1(%arg0: i32) -> (i32, i32) {
    %c0_i32 = arith.constant 0 : i32
    %c0_i32_0 = arith.constant 0 : i32
    return %arg0, %c0_i32 : i32, i32
  }
  func.func @transform_2(%arg0: i32) -> (i32, i32) {
    %c0_i32 = arith.constant 0 : i32
    %c0_i32_0 = arith.constant 0 : i32
    %c0_i32_1 = arith.constant 0 : i32
    return %c0_i32, %c0_i32_0 : i32, i32
  }
  func.func @transform_3(%arg0: i32) -> (i32, i32) {
    %c0_i32 = arith.constant 0 : i32
    %c0_i32_0 = arith.constant 0 : i32
    %c0_i32_1 = arith.constant 0 : i32
    return %c0_i32, %c0_i32_0 : i32, i32
  }
  func.func @transform_4(%arg0: i32) -> (i32, i32) {
    %c0_i32 = arith.constant 0 : i32
    %c0_i32_0 = arith.constant 0 : i32
    %c0_i32_1 = arith.constant 0 : i32
    return %c0_i32, %c0_i32_0 : i32, i32
  }
  func.func @transform_5(%arg0: i32) -> (i32, i32) {
    %c0_i32 = arith.constant 0 : i32
    %c0_i32_0 = arith.constant 0 : i32
    return %arg0, %c0_i32 : i32, i32
  }
}

</mosaic_0001>

<bundles_post_ra>
// kernel: tpu_custom_call.1
= control target key start
LH: loop header
LB: loop body
LE: loop exit
PB: predicated region body
PF: predicated region fallthrough
CT: control target
= control target key end

     0   :  { %vm22_vm0 = vcmask 57344   ;;  %s786_s0 = inlined_call_operand.vmem [shape: f32[1,8], index: 0, kind: input, shape index: {}]   ;;  %s787_s1 = inlined_call_operand.vmem [shape: f32[2,256], index: 1, kind: input, shape index: {}]   ;;  %s788_s2 = inlined_call_operand.vmem [shape: f32[256,32], index: 2, kind: input, shape index: {}]   ;;  %s789_s3 = inlined_call_operand.vmem [shape: f32[256,8], index: 3, kind: input, shape index: {}]   ;;  %s790_s4 = inlined_call_operand.vmem [shape: f32[1,32], index: 4, kind: input, shape index: {}]   ;;  %s791_s5 = inlined_call_operand.hbm [shape: f32[2,32], index: 5, kind: output, shape index: {}]  }
   0x1   :  { %v21_v0 = vld [vmem:[%s786_s0] sm:$0x1] }
   0x2   :  { %10 = vsyncpa [#allocation3], 0  ;;  %v23_v1 = vsel %vm22_vm0, %v21_v0, -inf  ;;  %v67_v8 = vlaneseq  ;;  %v50_v13 = vld [vmem:[%s789_s3 + $0x80] sm:$0xff]  ;;  %vm104_vm1 = vcmask 64512   ;;  %v51_v16 = vld [vmem:[%s789_s3 + $0x88] sm:$0xff] }
   0x3   :  { %24 = vmax.xlane.f32.xlu0 %v23_v1  ;;  %v34_v14 = vld [vmem:[%s789_s3] sm:$0xff]  ;;  %v52_v17 = vld [vmem:[%s789_s3 + $0x90] sm:$0xff]  ;;  %v35_v24 = vld [vmem:[%s789_s3 + $0x8] sm:$0xff]  ;;  %s468_s16 = smov [#allocation2]   ;;  %vm354_vm2 = vcmask 254976  }
   0x4   :  { %v68_v9 = vshrl.u32 %v67_v8, 7  ;;  %v36_v25 = vld [vmem:[%s789_s3 + $0x10] sm:$0xff]  ;;  %v53_v30 = vld [vmem:[%s789_s3 + $0x98] sm:$0xff]  ;;  %v54_v31 = vld [vmem:[%s789_s3 + $0xa0] sm:$0xff]  ;;  %s362_s17 = sshll.u32 %s468_s16, 4  ;;  %s363_s17 = int_to_ptr.vmem [resolvable:$true] %s362_s17 }
   0x5   :  { %v49_v36 = vld [vmem:[%s789_s3 + $0x78] sm:$0xff]  ;;  %v38_v38 = vld [vmem:[%s789_s3 + $0x20] sm:$0xff]  ;;  %v55_v44 = vld [vmem:[%s789_s3 + $0xa8] sm:$0xff]  ;;  %p449_p1 = scmp.lt.s32.totalorder %s363_s17, %s363_s17 }
   0x6   :  { %v69_v10 = vsub.s32 0, %v68_v9  ;;  %v37_v37 = vld [vmem:[%s789_s3 + $0x18] sm:$0xff]  ;;  %v56_v45 = vld [vmem:[%s789_s3 + $0xb0] sm:$0xff]  ;;  %v39_v51 = vld [vmem:[%s789_s3 + $0x28] sm:$0xff] }
   0x7   :  { %v40_v52 = vld [vmem:[%s789_s3 + $0x30] sm:$0xff]  ;;  %v57_v57 = vld [vmem:[%s789_s3 + $0xb8] sm:$0xff]  ;;  %v58_v58 = vld [vmem:[%s789_s3 + $0xc0] sm:$0xff] }
   0x8   :  { %v41_v63 = vld [vmem:[%s789_s3 + $0x38] sm:$0xff] }
  0x90   :  { %v25_v2 = vpop.xlane.xlu0 %24 }
  0x91   :  { %v26_v3 = vsub.f32 %v21_v0, %v25_v2  ;;  %v42_v0 = vld [vmem:[%s789_s3 + $0x40] sm:$0xff] }
  0x93   :  { %v27_v4 = vmul.f32 1.442695, %v26_v3 }
  0x95   :  { %440 = vpow2.f32 %v27_v4 }
  0x9f   :  { %v441_v5 = vpop.eup %440 }
  0xa0   :  { %v29_v6 = vsel %vm22_vm0, %v441_v5, 0.0 }
  0xa1   :  { %30 = vadd.xlane.f32.xlu0 %v29_v6  ;;  %v60_v6 = vld [vmem:[%s789_s3 + $0xd0] sm:$0xff] }
 0x12e   :  { %v31_v7 = vpop.xlane.xlu0 %30 }
 0x12f   :  { %442 = vrcp.f32 %v31_v7 }
 0x139   :  { %v443_v11 = vpop.eup %442 }
 0x13a   :  { %v33_v12 = vmul.f32 %v443_v11, %v441_v5  ;;  %v59_v5 = vld [vmem:[%s789_s3 + $0xc8] sm:$0xff] }
 0x13b   :  { %v43_v11 = vld [vmem:[%s789_s3 + $0x48] sm:$0xff] }
 0x13c   :  { %v508_v15 = vrot.slane %v33_v12, %v69_v10  ;;  %v44_v12 = vld [vmem:[%s789_s3 + $0x50] sm:$0xff] }
 0x13e   :  { %v88_v18 = vmul.f32 %v508_v15, %v50_v13  ;;  %v72_v19 = vmul.f32 %v508_v15, %v34_v14  ;;  %v89_v22 = vmul.f32 %v508_v15, %v51_v16  ;;  %v90_v23 = vmul.f32 %v508_v15, %v52_v17 }
 0x13f   :  { %v73_v28 = vmul.f32 %v508_v15, %v35_v24  ;;  %v74_v29 = vmul.f32 %v508_v15, %v36_v25  ;;  %v91_v34 = vmul.f32 %v508_v15, %v53_v30  ;;  %v92_v35 = vmul.f32 %v508_v15, %v54_v31  ;;  %v45_v24 = vld [vmem:[%s789_s3 + $0x58] sm:$0xff]  ;;  %v46_v25 = vld [vmem:[%s789_s3 + $0x60] sm:$0xff]  ;;  %v63_v30 = vld [vmem:[%s789_s3 + $0xe8] sm:$0xff] }
 0x140   :  { %v153_v20 = vsel %vm104_vm1, %v88_v18, 0.0  ;;  %v105_v21 = vsel %vm104_vm1, %v72_v19, 0.0  ;;  %v156_v26 = vsel %vm104_vm1, %v89_v22, 0.0  ;;  %v159_v27 = vsel %vm104_vm1, %v90_v23, 0.0  ;;  %v61_v18 = vld [vmem:[%s789_s3 + $0xd8] sm:$0xff]  ;;  %v62_v19 = vld [vmem:[%s789_s3 + $0xe0] sm:$0xff] }
 0x141   :  { %154 = vadd.xlane.f32.xlu1 %v153_v20  ;;  %106 = vadd.xlane.f32.xlu0 %v105_v21  ;;  %v108_v32 = vsel %vm104_vm1, %v73_v28, 0.0  ;;  %v111_v33 = vsel %vm104_vm1, %v74_v29, 0.0  ;;  %v87_v39 = vmul.f32 %v508_v15, %v49_v36  ;;  %v162_v40 = vsel %vm104_vm1, %v91_v34, 0.0  ;;  %v64_v31 = vld [vmem:[%s789_s3 + $0xf0] sm:$0xff]  ;;  %v47_v36 = vld [vmem:[%s789_s3 + $0x68] sm:$0xff] }
 0x142   :  { %v165_v41 = vsel %vm104_vm1, %v92_v35, 0.0  ;;  %v75_v42 = vmul.f32 %v508_v15, %v37_v37  ;;  %v76_v43 = vmul.f32 %v508_v15, %v38_v38  ;;  %v93_v49 = vmul.f32 %v508_v15, %v55_v44  ;;  %v48_v37 = vld [vmem:[%s789_s3 + $0x70] sm:$0xff] }
 0x143   :  { %v563_v46 = vsel %vm104_vm1, %v87_v39, 0.0  ;;  %v94_v50 = vmul.f32 %v508_v15, %v56_v45  ;;  %v77_v55 = vmul.f32 %v508_v15, %v39_v51  ;;  %v78_v56 = vmul.f32 %v508_v15, %v40_v52  ;;  %v218_v52 = vld [vmem:[%s788_s2 + $0x88] sm:$0xff] }
 0x144   :  { %v114_v47 = vsel %vm104_vm1, %v75_v42, 0.0  ;;  %v117_v48 = vsel %vm104_vm1, %v76_v43, 0.0  ;;  %v168_v53 = vsel %vm104_vm1, %v93_v49, 0.0  ;;  %v95_v61 = vmul.f32 %v508_v15, %v57_v57  ;;  %v65_v42 = vld [vmem:[%s789_s3 + $0xf8] sm:$0xff]  ;;  %v202_v57 = vld [vmem:[%s788_s2 + $0x8] sm:$0xff] }
 0x145   :  { %157 = vadd.xlane.f32.xlu1 %v156_v26  ;;  %160 = vadd.xlane.f32.xlu0 %v159_v27  ;;  %v171_v54 = vsel %vm104_vm1, %v94_v50, 0.0  ;;  %v120_v59 = vsel %vm104_vm1, %v77_v55, 0.0  ;;  %v123_v60 = vsel %vm104_vm1, %v78_v56, 0.0  ;;  %v96_v62 = vmul.f32 %v508_v15, %v58_v58  ;;  %v201_v56 = vld [vmem:[%s788_s2] sm:$0xff] }
 0x146   :  { %v174_v1 = vsel %vm104_vm1, %v95_v61, 0.0  ;;  %v79_v3 = vmul.f32 %v508_v15, %v41_v63  ;;  %v80_v4 = vmul.f32 %v508_v15, %v42_v0  ;;  %v97_v9 = vmul.f32 %v508_v15, %v59_v5  ;;  %v219_v63 = vld [vmem:[%s788_s2 + $0x90] sm:$0xff]  ;;  %v220_v0 = vld [vmem:[%s788_s2 + $0x98] sm:$0xff] }
 0x147   :  { %v177_v2 = vsel %vm104_vm1, %v96_v62, 0.0  ;;  %v98_v10 = vmul.f32 %v508_v15, %v60_v6  ;;  %v81_v16 = vmul.f32 %v508_v15, %v43_v11  ;;  %v82_v17 = vmul.f32 %v508_v15, %v44_v12  ;;  %v203_v6 = vld [vmem:[%s788_s2 + $0x10] sm:$0xff] }
 0x148   :  { %v126_v7 = vsel %vm104_vm1, %v79_v3, 0.0  ;;  %v129_v8 = vsel %vm104_vm1, %v80_v4, 0.0  ;;  %v180_v13 = vsel %vm104_vm1, %v97_v9, 0.0  ;;  %v99_v22 = vmul.f32 %v508_v15, %v61_v18 }
 0x149   :  { %109 = vadd.xlane.f32.xlu1 %v108_v32  ;;  %112 = vadd.xlane.f32.xlu0 %v111_v33  ;;  %v183_v14 = vsel %vm104_vm1, %v98_v10, 0.0  ;;  %v132_v20 = vsel %vm104_vm1, %v81_v16, 0.0  ;;  %v135_v21 = vsel %vm104_vm1, %v82_v17, 0.0  ;;  %v100_v23 = vmul.f32 %v508_v15, %v62_v19 }
 0x14a   :  { %v186_v26 = vsel %vm104_vm1, %v99_v22, 0.0  ;;  %v83_v28 = vmul.f32 %v508_v15, %v45_v24  ;;  %v84_v29 = vmul.f32 %v508_v15, %v46_v25  ;;  %v101_v34 = vmul.f32 %v508_v15, %v63_v30  ;;  %v206_v22 = vld [vmem:[%s788_s2 + $0x28] sm:$0xff] }
 0x14b   :  { %v189_v27 = vsel %vm104_vm1, %v100_v23, 0.0  ;;  %v102_v35 = vmul.f32 %v508_v15, %v64_v31  ;;  %v103_v45 = vmul.f32 %v508_v15, %v65_v42  ;;  %v225_v42 = vld [vmem:[%s788_s2 + $0xc0] sm:$0xff] }
 0x14c   :  { %v138_v32 = vsel %vm104_vm1, %v83_v28, 0.0  ;;  %v141_v33 = vsel %vm104_vm1, %v84_v29, 0.0  ;;  %v192_v38 = vsel %vm104_vm1, %v101_v34, 0.0  ;;  %v223_v28 = vld [vmem:[%s788_s2 + $0xb0] sm:$0xff]  ;;  %v224_v29 = vld [vmem:[%s788_s2 + $0xb8] sm:$0xff] }
 0x14d   :  { %163 = vadd.xlane.f32.xlu1 %v162_v40  ;;  %166 = vadd.xlane.f32.xlu0 %v165_v41  ;;  %v195_v39 = vsel %vm104_vm1, %v102_v35, 0.0  ;;  %v85_v40 = vmul.f32 %v508_v15, %v47_v36  ;;  %v86_v41 = vmul.f32 %v508_v15, %v48_v37  ;;  %v217_v15 = vld [vmem:[%s788_s2 + $0x80] sm:$0xff]  ;;  %v207_v35 = vld [vmem:[%s788_s2 + $0x30] sm:$0xff]  ;;  %v208_v36 = vld [vmem:[%s788_s2 + $0x38] sm:$0xff] }
 0x14f   :  { %v144_v43 = vsel %vm104_vm1, %v85_v40, 0.0  ;;  %v147_v44 = vsel %vm104_vm1, %v86_v41, 0.0 }
 0x151   :  { %115 = vadd.xlane.f32.xlu1 %v114_v47  ;;  %118 = vadd.xlane.f32.xlu0 %v117_v48  ;;  %v198_v47 = vsel %vm104_vm1, %v103_v45, 0.0  ;;  %v670_v48 = vld.sshfl [vmem:[%s787_s1] sm:$0x33 pattern:$0x76325410] }
 0x152   :  { %v281_v49 = vcombine.high %v670_v48, %v670_v48 }
 0x154   :  { %348 = vmatprep.mubr.f32.mxu0 %v281_v49 }
 0x155   :  { %169 = vadd.xlane.f32.xlu1 %v168_v53  ;;  %172 = vadd.xlane.f32.xlu0 %v171_v54 }
 0x159   :  { %121 = vadd.xlane.f32.xlu1 %v120_v59  ;;  %124 = vadd.xlane.f32.xlu0 %v123_v60 }
 0x15d   :  { %175 = vadd.xlane.f32.xlu1 %v174_v1  ;;  %178 = vadd.xlane.f32.xlu0 %v177_v2 }
 0x161   :  { %127 = vadd.xlane.f32.xlu1 %v126_v7  ;;  %130 = vadd.xlane.f32.xlu0 %v129_v8  ;;  %v204_v7 = vld [vmem:[%s788_s2 + $0x18] sm:$0xff] }
 0x165   :  { %181 = vadd.xlane.f32.xlu1 %v180_v13  ;;  %184 = vadd.xlane.f32.xlu0 %v183_v14  ;;  %v221_v13 = vld [vmem:[%s788_s2 + $0xa0] sm:$0xff]  ;;  %v222_v14 = vld [vmem:[%s788_s2 + $0xa8] sm:$0xff] }
 0x169   :  { %133 = vadd.xlane.f32.xlu1 %v132_v20  ;;  %136 = vadd.xlane.f32.xlu0 %v135_v21  ;;  %v205_v21 = vld [vmem:[%s788_s2 + $0x20] sm:$0xff] }
 0x16d   :  { %187 = vadd.xlane.f32.xlu1 %v186_v26  ;;  %190 = vadd.xlane.f32.xlu0 %v189_v27 }
 0x171   :  { %139 = vadd.xlane.f32.xlu1 %v138_v32  ;;  %142 = vadd.xlane.f32.xlu0 %v141_v33 }
 0x175   :  { %193 = vadd.xlane.f32.xlu1 %v192_v38  ;;  %196 = vadd.xlane.f32.xlu0 %v195_v39 }
 0x179   :  { %145 = vadd.xlane.f32.xlu1 %v144_v43  ;;  %148 = vadd.xlane.f32.xlu0 %v147_v44  ;;  %v226_v43 = vld [vmem:[%s788_s2 + $0xc8] sm:$0xff] }
 0x17d   :  { %199 = vadd.xlane.f32.xlu1 %v198_v47 }
 0x181   :  { %151 = vadd.xlane.f32.xlu1 %v563_v46 }
 0x1ce   :  { %v155_v50 = vpop.xlane.xlu1 %154  ;;  %v107_v51 = vpop.xlane.xlu0 %106 }
 0x1cf   :  { %v249_v54 = vmul.f32 %v217_v15, %v155_v50  ;;  %v233_v61 = vmul.f32 %v201_v56, %v107_v51  ;;  %v209_v51 = vld [vmem:[%s788_s2 + $0x40] sm:$0xff]  ;;  %v210_v15 = vld [vmem:[%s788_s2 + $0x48] sm:$0xff]  ;;  %v227_v56 = vld [vmem:[%s788_s2 + $0xd0] sm:$0xff] }
 0x1d2   :  { %v158_v46 = vpop.xlane.xlu1 %157  ;;  %v161_v53 = vpop.xlane.xlu0 %160 }
 0x1d3   :  { %v250_v55 = vmul.f32 %v218_v52, %v158_v46  ;;  %v251_v4 = vmul.f32 %v219_v63, %v161_v53  ;;  %v211_v63 = vld [vmem:[%s788_s2 + $0x50] sm:$0xff] }
 0x1d5   :  { %v407_v58 = vpack.c.bf16 %v250_v55, %v249_v54 }
 0x1d6   :  { %v110_v59 = vpop.xlane.xlu1 %109  ;;  %v113_v60 = vpop.xlane.xlu0 %112 }
 0x1d7   :  { %v234_v62 = vmul.f32 %v202_v57, %v110_v59  ;;  %408 = vmatprep.subr.bf16.mxu0 %v407_v58  ;;  %v235_v11 = vmul.f32 %v203_v6, %v113_v60  ;;  %v228_v57 = vld [vmem:[%s788_s2 + $0xd8] sm:$0xff] }
 0x1d9   :  { %v409_v1 = vpack.c.bf16 %v234_v62, %v233_v61 }
 0x1da   :  { %v164_v2 = vpop.xlane.xlu1 %163  ;;  %v167_v3 = vpop.xlane.xlu0 %166 }
 0x1db   :  { %v252_v5 = vmul.f32 %v220_v0, %v164_v2  ;;  %410 = vmatpush3.bf16.msra.mxu0 %v409_v1  ;;  %v253_v19 = vmul.f32 %v221_v13, %v167_v3  ;;  %v212_v0 = vld [vmem:[%s788_s2 + $0x58] sm:$0xff]  ;;  %v214_v13 = vld [vmem:[%s788_s2 + $0x68] sm:$0xff] }
 0x1dd   :  { %v411_v8 = vpack.c.bf16 %v252_v5, %v251_v4  ;;  %v229_v5 = vld [vmem:[%s788_s2 + $0xe0] sm:$0xff] }
 0x1de   :  { %v116_v9 = vpop.xlane.xlu1 %115  ;;  %v119_v10 = vpop.xlane.xlu0 %118 }
 0x1df   :  { %v236_v12 = vmul.f32 %v204_v7, %v116_v9  ;;  %412 = vmatprep.subr.bf16.mxu0 %v411_v8  ;;  %v237_v26 = vmul.f32 %v205_v21, %v119_v10  ;;  %v230_v7 = vld [vmem:[%s788_s2 + $0xe8] sm:$0xff]  ;;  %v232_v21 = vld [vmem:[%s788_s2 + $0xf8] sm:$0xff] }
 0x1e1   :  { %v413_v16 = vpack.c.bf16 %v236_v12, %v235_v11  ;;  %v213_v12 = vld [vmem:[%s788_s2 + $0x60] sm:$0xff] }
 0x1e2   :  { %v170_v17 = vpop.xlane.xlu1 %169  ;;  %v173_v18 = vpop.xlane.xlu0 %172 }
 0x1e3   :  { %v254_v20 = vmul.f32 %v222_v14, %v170_v17  ;;  %414 = vmatpush3.bf16.msra.mxu0 %v413_v16  ;;  %v255_v33 = vmul.f32 %v223_v28, %v173_v18  ;;  %v216_v28 = vld [vmem:[%s788_s2 + $0x78] sm:$0xff] }
 0x1e5   :  { %v415_v23 = vpack.c.bf16 %v254_v20, %v253_v19  ;;  %v231_v20 = vld [vmem:[%s788_s2 + $0xf0] sm:$0xff] }
 0x1e6   :  { %v122_v24 = vpop.xlane.xlu1 %121  ;;  %v125_v25 = vpop.xlane.xlu0 %124 }
 0x1e7   :  { %v238_v27 = vmul.f32 %v206_v22, %v122_v24  ;;  %416 = vmatprep.subr.bf16.mxu0 %v415_v23  ;;  %v239_v40 = vmul.f32 %v207_v35, %v125_v25  ;;  %v370_v35 = vld [vmem:[%s790_s4] ss:$0 sm:$0xff] }
 0x1e9   :  { %v417_v30 = vpack.c.bf16 %v238_v27, %v237_v26  ;;  %v215_v26 = vld [vmem:[%s788_s2 + $0x70] sm:$0xff]  ;;  %s444_s2 = scalar_lea.vmem %s363_s17, 32 }
 0x1ea   :  { %v176_v31 = vpop.xlane.xlu1 %175  ;;  %v179_v32 = vpop.xlane.xlu0 %178  ;;  %p445_p0 = scmp.ne.s32.totalorder %s363_s17, %s444_s2  ;;  %p450_p2 = scmp.lt.s32.totalorder %s444_s2, %s444_s2 }
 0x1eb   :  { %v256_v34 = vmul.f32 %v224_v29, %v176_v31  ;;  %418 = vmatpush3.bf16.msra.mxu0 %v417_v30  ;;  %v257_v49 = vmul.f32 %v225_v42, %v179_v32 }
 0x1ec   :  { %p451_p3 = por %p450_p2, %p449_p1 }
 0x1ed   :  { %v419_v37 = vpack.c.bf16 %v256_v34, %v255_v33 }
 0x1ee   :  { %v128_v38 = vpop.xlane.xlu1 %127  ;;  %v131_v39 = vpop.xlane.xlu0 %130  ;;  %p452_p4 = pnand %p451_p3, %p445_p0 }
 0x1ef   :  { %v240_v41 = vmul.f32 %v208_v36, %v128_v38  ;;  %420 = vmatprep.subr.bf16.mxu0 %v419_v37  ;;  %v241_v54 = vmul.f32 %v209_v51, %v131_v39 }
 0x1f1   :  { %v421_v44 = vpack.c.bf16 %v240_v41, %v239_v40 }
 0x1f2   :  { %v182_v45 = vpop.xlane.xlu1 %181  ;;  %v185_v47 = vpop.xlane.xlu0 %184 }
 0x1f3   :  { %v258_v50 = vmul.f32 %v226_v43, %v182_v45  ;;  %422 = vmatpush3.bf16.msra.mxu0 %v421_v44  ;;  %v259_v61 = vmul.f32 %v227_v56, %v185_v47 }
 0x1f5   :  { %v423_v52 = vpack.c.bf16 %v258_v50, %v257_v49 }
 0x1f6   :  { %v134_v46 = vpop.xlane.xlu1 %133  ;;  %v137_v53 = vpop.xlane.xlu0 %136 }
 0x1f7   :  { %v242_v55 = vmul.f32 %v210_v15, %v134_v46  ;;  %424 = vmatprep.subr.bf16.mxu0 %v423_v52  ;;  %v243_v3 = vmul.f32 %v211_v63, %v137_v53 }
 0x1f9   :  { %v425_v58 = vpack.c.bf16 %v242_v55, %v241_v54 }
 0x1fa   :  { %v188_v59 = vpop.xlane.xlu1 %187  ;;  %v191_v60 = vpop.xlane.xlu0 %190 }
 0x1fb   :  { %v260_v62 = vmul.f32 %v228_v57, %v188_v59  ;;  %426 = vmatpush3.bf16.msra.mxu0 %v425_v58  ;;  %v261_v10 = vmul.f32 %v229_v5, %v191_v60 }
 0x1fd   :  { %v427_v1 = vpack.c.bf16 %v260_v62, %v259_v61 }
 0x1fe   :  { %v140_v2 = vpop.xlane.xlu1 %139  ;;  %v143_v6 = vpop.xlane.xlu0 %142 }
 0x1ff   :  { %v244_v4 = vmul.f32 %v212_v0, %v140_v2  ;;  %428 = vmatprep.subr.bf16.mxu0 %v427_v1  ;;  %v245_v18 = vmul.f32 %v213_v12, %v143_v6 }
 0x201   :  { %v429_v8 = vpack.c.bf16 %v244_v4, %v243_v3 }
 0x202   :  { %v194_v9 = vpop.xlane.xlu1 %193  ;;  %v197_v16 = vpop.xlane.xlu0 %196 }
 0x203   :  { %v262_v11 = vmul.f32 %v230_v7, %v194_v9  ;;  %430 = vmatpush3.bf16.msra.mxu0 %v429_v8  ;;  %v263_v24 = vmul.f32 %v231_v20, %v197_v16 }
 0x205   :  { %v431_v14 = vpack.c.bf16 %v262_v11, %v261_v10 }
 0x206   :  { %v146_v17 = vpop.xlane.xlu1 %145  ;;  %v149_v27 = vpop.xlane.xlu0 %148 }
 0x207   :  { %v246_v19 = vmul.f32 %v214_v13, %v146_v17  ;;  %432 = vmatprep.subr.bf16.mxu0 %v431_v14  ;;  %v247_v31 = vmul.f32 %v215_v26, %v149_v27 }
 0x209   :  { %v433_v22 = vpack.c.bf16 %v246_v19, %v245_v18 }
 0x20a   :  { %v200_v23 = vpop.xlane.xlu1 %199 }
 0x20b   :  { %v264_v25 = vmul.f32 %v232_v21, %v200_v23  ;;  %434 = vmatpush3.bf16.msra.mxu0 %v433_v22 }
 0x20d   :  { %v435_v29 = vpack.c.bf16 %v264_v25, %v263_v24 }
 0x20e   :  { %v152_v30 = vpop.xlane.xlu1 %151 }
 0x20f   :  { %v248_v32 = vmul.f32 %v216_v28, %v152_v30  ;;  %436 = vmatprep.subr.bf16.mxu0 %v435_v29 }
 0x211   :  { %v437_v33 = vpack.c.bf16 %v248_v32, %v247_v31 }
 0x213   :  { %438 = vmatpush3.bf16.msra.mxu0 %v437_v33 }
 0x216   :  { %349 = vmatmul.mubr.f32.vlgmr.msra.gmra.mrb[0].mxu0 %v670_v48 }
 0x2e9   :  { %v404_v34 = vpop.f32.mrb[0].mxu0 }
 0x2ea   :  { %v405_v36 = vpop.f32.mrb[1].mxu0 }
 0x2eb   :  { %v406_v37 = vadd.f32 %v405_v36, %v404_v34 }
 0x2ed   :  { %v351_v38 = vadd.f32 %v406_v37, %v370_v35 }
 0x2ef   :  { %355 = vst.msk [vmem:[#allocation2] sm:$0x3] %vm354_vm2, %v351_v38 }
 0x2f0   :  { %455 = shalt.err (!%p452_p4)
}
 0x2f1   :  { %s456_s20 = scalar_lea.hbm %s791_s5, 32 }
 0x2f2   :  { %p457_p5 = scmp.ne.s32.totalorder %s791_s5, %s456_s20  ;;  %p460_p6 = scmp.lt.u32.totalorder %s456_s20, %s791_s5 }
 0x2f4   :  { %p462_p7 = pnand %p460_p6, %p457_p5 }
 0x2f6   :  { %465 = shalt.err (!%p462_p7)
}
 0x2f7   :  { %365 = dma.vmem_to_hbm [thread:$0]  %s363_s17, 32, %s791_s5, [#allocation3]  }
 0x2f8   :  { %466 = dma.done.wait [#allocation3], 32  }
 0x2f9   :  { %467 = vsyncadd [#allocation3], 4294967264 }
 0x2fa   :  { %369 = vsyncpa [#allocation3], 1 }

</bundles_post_ra>
